<compile_context>
chip_gen: v7x
topology: tpu7x:2x2x1
jax: 0.10.0
libtpu: 0.0.40
codegen_flags: <defaults>
</compile_context>

<pallas_src>
import jax
import jax.numpy as jnp
from jax.experimental import pallas as pl
from jax.experimental.pallas import tpu as pltpu


def _ga_kernel(x_ref, mask_ref, wqa_ref, bs_ref, wv_ref, bv_ref, z_ref, a_ref):
    bt, s_len, e_dim = x_ref.shape
    x3 = x_ref[...]                                              # (Bt, S, E)

    # ---- folded score path: s = x @ (Wq @ Wa) + (bq @ Wa + ba) ----
    q3 = jnp.broadcast_to(wqa_ref[...], (bt, 1, e_dim))          # (Bt, 1, E)
    scores = jnp.einsum("bqe,bke->bqk", q3, x3,
                        preferred_element_type=jnp.float32)      # (Bt, 1, S)
    scores = scores + bs_ref[...]                                # broadcast (1, 1)
    scores = jnp.where(mask_ref[...] > 0.5, -jnp.inf, scores)    # masked_fill

    # ---- softmax over the sequence axis (lane axis here) ----
    smax = jnp.max(scores, axis=-1, keepdims=True)               # (Bt, 1, 1)
    expd = jnp.exp(scores - smax)                                # (Bt, 1, S); exp(-inf)=0
    denom = jnp.sum(expd, axis=-1, keepdims=True)                # (Bt, 1, 1)
    attn = expd * pl.reciprocal(denom)                           # (Bt, 1, S)
    a_ref[...] = attn.astype(a_ref.dtype)                        # lane-dense store

    # ---- v projection: one MXU matmul over all Bt*S rows of the block ----
    x2 = x3.reshape(bt * s_len, e_dim)                           # (Bt*S, E)
    v2 = jnp.dot(x2, wv_ref[...],
                 preferred_element_type=jnp.float32) + bv_ref[...]
    v3 = v2.reshape(bt, s_len, e_dim)                            # (Bt, S, E)

    # ---- z = sum_s a * v  (batched (1,S) x (S,E) matmul) ----
    z = jnp.einsum("bqk,bke->bqe", attn, v3,
                   preferred_element_type=jnp.float32)           # (Bt, 1, E)
    z_ref[...] = z.astype(z_ref.dtype)


def globa_attention(x, mask_bool, wq, bq, wv, bv, wa, ba):
    """x: (B,S,E) f32; mask_bool: (B,S) bool (True = masked out).
    Weights stored (in, out): wq:(E,H) bq:(H,) wv:(E,E) bv:(E,) wa:(H,1) ba:(1,)."""
    B, S, E = x.shape

    # Algebraic fold of the whole score path (done once, outside the kernel).
    wqa_row = (wq @ wa).reshape(1, E)                 # (1, E)   = Wq @ Wa
    bs = (bq @ wa + ba).reshape(1, 1)                 # (1, 1)   = bq @ Wa + ba

    # Lane-dense auxiliary layouts.
    mask_f = mask_bool.astype(jnp.float32).reshape(B, 1, S)   # 1.0 == masked
    bv2 = bv.reshape(1, E)

    # Batch rows per grid step: aim for ~512 MXU rows (Bt*S), never more than B.
    # (At the toy sizes below this means the whole batch in a single grid step.)
    bt = max(1, min(B, -(-512 // S)))
    while B % bt:
        bt -= 1
    nb = B // bt

    z3, a3 = pl.pallas_call(
        _ga_kernel,
        out_shape=(
            jax.ShapeDtypeStruct((B, 1, E), x.dtype),     # z (lane-dense)
            jax.ShapeDtypeStruct((B, 1, S), x.dtype),     # a (lane-dense)
        ),
        grid_spec=pltpu.PrefetchScalarGridSpec(
            num_scalar_prefetch=0,
            grid=(nb,),
            in_specs=[
                pl.BlockSpec((bt, S, E), lambda i: (i, 0, 0)),   # x
                pl.BlockSpec((bt, 1, S), lambda i: (i, 0, 0)),   # mask
                pl.BlockSpec((1, E), lambda i: (0, 0)),          # Wq @ Wa
                pl.BlockSpec((1, 1), lambda i: (0, 0)),          # bq @ Wa + ba
                pl.BlockSpec((E, E), lambda i: (0, 0)),          # Wv
                pl.BlockSpec((1, E), lambda i: (0, 0)),          # bv
            ],
            out_specs=[
                pl.BlockSpec((bt, 1, E), lambda i: (i, 0, 0)),   # z
                pl.BlockSpec((bt, 1, S), lambda i: (i, 0, 0)),   # a
            ],
        ),
        # Tiny per-step work: keep everything on one TensorCore rather than
        # paying cross-core launch/DMA cost (per v7x feedback).
        compiler_params=pltpu.CompilerParams(
            dimension_semantics=("arbitrary",)),
    )(x, mask_f, wqa_row, bs, wv, bv2)

    z = z3.reshape(B, E)
    a = a3.reshape(B, S, 1)   # match softmax(s, dim=-2) output shape of the module
    return z, a


def _reference(x, mask_bool, wq, bq, wv, bv, wa, ba):
    h = x @ wq + bq
    v = x @ wv + bv
    s = h @ wa + ba
    s = jnp.where(mask_bool[..., None], -jnp.inf, s)
    a = jax.nn.softmax(s, axis=-2)
    z = (v * a).sum(-2)
    return z, a


if __name__ == "__main__":
    # configuration: embedding_size=32, GA_hidden=16
    B, S, E, H = 2, 8, 32, 16

    key = jax.random.PRNGKey(0)
    kx, kq, kbq, kv, kbv, ka, kba = jax.random.split(key, 7)

    x = jax.random.normal(kx, (B, S, E), dtype=jnp.float32)

    # Deterministic parameter init (PyTorch Linear-style uniform ranges).
    def uinit(k, shape, fan_in):
        bound = 1.0 / (fan_in ** 0.5)
        return jax.random.uniform(k, shape, jnp.float32, -bound, bound)

    wq = uinit(kq, (E, H), E)     # stored as (in, out)
    bq = uinit(kbq, (H,), E)
    wv = uinit(kv, (E, E), E)
    bv = uinit(kbv, (E,), E)
    wa = uinit(ka, (H, 1), H)
    ba = uinit(kba, (1,), H)

    # mask: True = masked out; keep at least one unmasked position per row
    # (a fully-masked row gives NaN, same as the PyTorch module).
    lens = jnp.array([6, 4], dtype=jnp.int32)
    mask_bool = jnp.arange(S)[None, :] >= lens[:, None]   # (B, S)

    z, a = globa_attention(x, mask_bool, wq, bq, wv, bv, wa, ba)
    jax.block_until_ready((z, a))

    z_ref, a_ref = _reference(x, mask_bool, wq, bq, wv, bv, wa, ba)
    # Tolerance covers the (exact-in-math) Wq@Wa fold reassociation in f32.
    assert jnp.allclose(z, z_ref, atol=1e-4, rtol=1e-4), "z mismatch"
    assert jnp.allclose(a, a_ref, atol=1e-4, rtol=1e-4), "a mismatch"

    print("KERNEL_OK")
</pallas_src>

<mosaic_0001>
module attributes {stable_mosaic.version = 11 : i64} {
  func.func @_ga_kernel(%arg0: i32, %arg1: memref<2x8x32xf32, #tpu.memory_space<vmem>>, %arg2: memref<2x1x8xf32, #tpu.memory_space<vmem>>, %arg3: memref<1x32xf32, #tpu.memory_space<vmem>>, %arg4: memref<1x1xf32, #tpu.memory_space<vmem>>, %arg5: memref<32x32xf32, #tpu.memory_space<vmem>>, %arg6: memref<1x32xf32, #tpu.memory_space<vmem>>, %arg7: memref<2x1x32xf32, #tpu.memory_space<vmem>>, %arg8: memref<2x1x8xf32, #tpu.memory_space<vmem>>) attributes {dimension_semantics = [#tpu.dimension_semantics<arbitrary>], iteration_bounds = array<i64: 1>, scalar_prefetch = 0 : i64, scratch_operands = 0 : i64, tpu.core_type = #tpu.core_type<tc>, window_params = [{transform_indices = @transform_0, window_bounds = array<i64: 2, 8, 32>}, {transform_indices = @transform_1, window_bounds = array<i64: 2, 1, 8>}, {pipeline_mode = #tpu.pipeline_mode<synchronous>, transform_indices = @transform_2, window_bounds = array<i64: 1, 32>}, {pipeline_mode = #tpu.pipeline_mode<synchronous>, transform_indices = @transform_3, window_bounds = array<i64: 1, 1>}, {pipeline_mode = #tpu.pipeline_mode<synchronous>, transform_indices = @transform_4, window_bounds = array<i64: 32, 32>}, {pipeline_mode = #tpu.pipeline_mode<synchronous>, transform_indices = @transform_5, window_bounds = array<i64: 1, 32>}, {transform_indices = @transform_6, window_bounds = array<i64: 2, 1, 32>}, {transform_indices = @transform_7, window_bounds = array<i64: 2, 1, 8>}]} {
    %c0 = arith.constant 0 : index
    %c0_0 = arith.constant 0 : index
    %c0_1 = arith.constant 0 : index
    %0 = vector.load %arg1[%c0, %c0_0, %c0_1] : memref<2x8x32xf32, #tpu.memory_space<vmem>>, vector<2x8x32xf32>
    %c0_2 = arith.constant 0 : index
    %c0_3 = arith.constant 0 : index
    %1 = vector.load %arg3[%c0_2, %c0_3] : memref<1x32xf32, #tpu.memory_space<vmem>>, vector<1x32xf32>
    %2 = vector.shape_cast %1 : vector<1x32xf32> to vector<1x1x32xf32>
    %3 = vector.broadcast %2 : vector<1x1x32xf32> to vector<2x1x32xf32>
    "tpu.trace_start"() <{level = 10 : i32, message = "bqe,bke->bqk"}> : () -> ()
    %cst = arith.constant dense<0.000000e+00> : vector<2x1x8xf32>
    %4 = tpu.matmul %3, %0, %cst {dimension_numbers = #tpu.dot_dimension_numbers<[2], [2], [1], [1], [0, 0, 0, 1, 1, 1], [0], [0]>} : vector<2x1x32xf32>, vector<2x8x32xf32>, vector<2x1x8xf32> -> vector<2x1x8xf32>
    "tpu.trace_stop"() : () -> ()
    %c0_4 = arith.constant 0 : index
    %c0_5 = arith.constant 0 : index
    %5 = vector.load %arg4[%c0_4, %c0_5] : memref<1x1xf32, #tpu.memory_space<vmem>>, vector<1x1xf32>
    %6 = vector.shape_cast %5 : vector<1x1xf32> to vector<1x1x1xf32>
    %7 = vector.broadcast %6 : vector<1x1x1xf32> to vector<2x1x8xf32>
    %8 = arith.addf %4, %7 : vector<2x1x8xf32>
    %c0_6 = arith.constant 0 : index
    %c0_7 = arith.constant 0 : index
    %c0_8 = arith.constant 0 : index
    %9 = vector.load %arg2[%c0_6, %c0_7, %c0_8] : memref<2x1x8xf32, #tpu.memory_space<vmem>>, vector<2x1x8xf32>
    %cst_9 = arith.constant 5.000000e-01 : f32
    %10 = vector.broadcast %cst_9 : f32 to vector<2x1x8xf32>
    %11 = arith.cmpf ogt, %9, %10 : vector<2x1x8xf32>
    %cst_10 = arith.constant 0xFF800000 : f32
    %12 = vector.broadcast %cst_10 : f32 to vector<2x1x8xf32>
    %13 = arith.select %11, %12, %8 : vector<2x1x8xi1>, vector<2x1x8xf32>
    %cst_11 = arith.constant dense<0xFF800000> : vector<2x1xf32>
    %14 = vector.multi_reduction <maximumf>, %13, %cst_11 [2] : vector<2x1x8xf32> to vector<2x1xf32>
    %15 = vector.shape_cast %14 : vector<2x1xf32> to vector<2x1x1xf32>
    %16 = vector.broadcast %15 : vector<2x1x1xf32> to vector<2x1x8xf32>
    %17 = arith.subf %13, %16 : vector<2x1x8xf32>
    %18 = math.exp %17 : vector<2x1x8xf32>
    %cst_12 = arith.constant dense<0.000000e+00> : vector<2x1xf32>
    %19 = vector.multi_reduction <add>, %18, %cst_12 [2] : vector<2x1x8xf32> to vector<2x1xf32>
    %20 = vector.shape_cast %19 : vector<2x1xf32> to vector<2x1x1xf32>
    %21 = tpu.reciprocal %20 : vector<2x1x1xf32> -> vector<2x1x1xf32>
    %22 = vector.broadcast %21 : vector<2x1x1xf32> to vector<2x1x8xf32>
    %23 = arith.mulf %18, %22 : vector<2x1x8xf32>
    %c0_13 = arith.constant 0 : index
    %c0_14 = arith.constant 0 : index
    %c0_15 = arith.constant 0 : index
    %24 = vector.load %arg8[%c0_13, %c0_14, %c0_15] : memref<2x1x8xf32, #tpu.memory_space<vmem>>, vector<2x1x8xf32>
    tpu.vector_store %arg8[%c0_13, %c0_14, %c0_15], %23 {strides = array<i32>} : memref<2x1x8xf32, #tpu.memory_space<vmem>>, vector<2x1x8xf32>,
    %25 = vector.shape_cast %0 : vector<2x8x32xf32> to vector<16x32xf32>
    %c0_16 = arith.constant 0 : index
    %c0_17 = arith.constant 0 : index
    %26 = vector.load %arg5[%c0_16, %c0_17] : memref<32x32xf32, #tpu.memory_space<vmem>>, vector<32x32xf32>
    %cst_18 = arith.constant dense<0.000000e+00> : vector<16x32xf32>
    %27 = tpu.matmul %25, %26, %cst_18 {dimension_numbers = #tpu.dot_dimension_numbers<[1], [0], [0], [1], [0, 0, 1, 1], [], []>} : vector<16x32xf32>, vector<32x32xf32>, vector<16x32xf32> -> vector<16x32xf32>
    %c0_19 = arith.constant 0 : index
    %c0_20 = arith.constant 0 : index
    %28 = vector.load %arg6[%c0_19, %c0_20] : memref<1x32xf32, #tpu.memory_space<vmem>>, vector<1x32xf32>
    %29 = vector.broadcast %28 : vector<1x32xf32> to vector<16x32xf32>
    %30 = arith.addf %27, %29 : vector<16x32xf32>
    %31 = vector.shape_cast %30 : vector<16x32xf32> to vector<2x8x32xf32>
    "tpu.trace_start"() <{level = 10 : i32, message = "bqk,bke->bqe"}> : () -> ()
    %cst_21 = arith.constant dense<0.000000e+00> : vector<2x1x32xf32>
    %32 = tpu.matmul %23, %31, %cst_21 {dimension_numbers = #tpu.dot_dimension_numbers<[2], [1], [1], [2], [0, 0, 0, 1, 1, 2], [0], [0]>} : vector<2x1x8xf32>, vector<2x8x32xf32>, vector<2x1x32xf32> -> vector<2x1x32xf32>
    "tpu.trace_stop"() : () -> ()
    %c0_22 = arith.constant 0 : index
    %c0_23 = arith.constant 0 : index
    %c0_24 = arith.constant 0 : index
    %33 = vector.load %arg7[%c0_22, %c0_23, %c0_24] : memref<2x1x32xf32, #tpu.memory_space<vmem>>, vector<2x1x32xf32>
    tpu.vector_store %arg7[%c0_22, %c0_23, %c0_24], %32 {strides = array<i32>} : memref<2x1x32xf32, #tpu.memory_space<vmem>>, vector<2x1x32xf32>,
    return
  }
  func.func @transform_0(%arg0: i32) -> (i32, i32, i32) {
    %c0_i32 = arith.constant 0 : i32
    %c0_i32_0 = arith.constant 0 : i32
    %c0_i32_1 = arith.constant 0 : i32
    return %arg0, %c0_i32, %c0_i32_0 : i32, i32, i32
  }
  func.func @transform_1(%arg0: i32) -> (i32, i32, i32) {
    %c0_i32 = arith.constant 0 : i32
    %c0_i32_0 = arith.constant 0 : i32
    %c0_i32_1 = arith.constant 0 : i32
    return %arg0, %c0_i32, %c0_i32_0 : i32, i32, i32
  }
  func.func @transform_2(%arg0: i32) -> (i32, i32) {
    %c0_i32 = arith.constant 0 : i32
    %c0_i32_0 = arith.constant 0 : i32
    %c0_i32_1 = arith.constant 0 : i32
    return %c0_i32, %c0_i32_0 : i32, i32
  }
  func.func @transform_3(%arg0: i32) -> (i32, i32) {
    %c0_i32 = arith.constant 0 : i32
    %c0_i32_0 = arith.constant 0 : i32
    %c0_i32_1 = arith.constant 0 : i32
    return %c0_i32, %c0_i32_0 : i32, i32
  }
  func.func @transform_4(%arg0: i32) -> (i32, i32) {
    %c0_i32 = arith.constant 0 : i32
    %c0_i32_0 = arith.constant 0 : i32
    %c0_i32_1 = arith.constant 0 : i32
    return %c0_i32, %c0_i32_0 : i32, i32
  }
  func.func @transform_5(%arg0: i32) -> (i32, i32) {
    %c0_i32 = arith.constant 0 : i32
    %c0_i32_0 = arith.constant 0 : i32
    %c0_i32_1 = arith.constant 0 : i32
    return %c0_i32, %c0_i32_0 : i32, i32
  }
  func.func @transform_6(%arg0: i32) -> (i32, i32, i32) {
    %c0_i32 = arith.constant 0 : i32
    %c0_i32_0 = arith.constant 0 : i32
    %c0_i32_1 = arith.constant 0 : i32
    return %arg0, %c0_i32, %c0_i32_0 : i32, i32, i32
  }
  func.func @transform_7(%arg0: i32) -> (i32, i32, i32) {
    %c0_i32 = arith.constant 0 : i32
    %c0_i32_0 = arith.constant 0 : i32
    %c0_i32_1 = arith.constant 0 : i32
    return %arg0, %c0_i32, %c0_i32_0 : i32, i32, i32
  }
}

</mosaic_0001>

<bundles_post_ra>
// kernel: tpu_custom_call.1
= control target key start
LH: loop header
LB: loop body
LE: loop exit
PB: predicated region body
PF: predicated region fallthrough
CT: control target
= control target key end

     0   :  { %s837_s0 = inlined_call_operand.hbm [shape: f32[2,8,32], index: 0, kind: input, shape index: {}]   ;;  %s838_s1 = inlined_call_operand.vmem [shape: f32[2,1,8], index: 1, kind: input, shape index: {}]   ;;  %s839_s2 = inlined_call_operand.vmem [shape: f32[1,32], index: 2, kind: input, shape index: {}]   ;;  %s840_s3 = inlined_call_operand.<no memory space> [shape: f32[1,1], index: 3, kind: input, shape index: {}]   ;;  %s841_s4 = inlined_call_operand.hbm [shape: f32[32,32], index: 4, kind: input, shape index: {}]   ;;  %s842_s5 = inlined_call_operand.vmem [shape: f32[1,32], index: 5, kind: input, shape index: {}]   ;;  %s843_s6 = inlined_call_operand.hbm [shape: f32[2,1,32], index: 6, kind: output, shape index: {0}]   ;;  %s844_s7 = inlined_call_operand.hbm [shape: f32[2,1,8], index: 7, kind: output, shape index: {1}]  }
   0x1   :  { %v13_v0 = vstv %s840_s3 }
   0x2   :  { %14 = vst [vmem:[#allocation2] sm:$0x1] %v13_v0 }
   0x3   :  { %15 = vsyncpa [#allocation4], 0 }
   0x4   :  { %16 = vsyncpa [#allocation7], 0 }
   0x5   :  { %17 = vsyncpa [#allocation5], 0 }
   0x6   :  { %18 = vsyncpa [#allocation10], 0  ;;  %s699_s26 = smov [#allocation3]   ;;  %s603_s30 = scalar_lea.hbm %s837_s0, 256 }
   0x7   :  { %s24_s27 = sshll.u32 %s699_s26, 4  ;;  %p604_p0 = scmp.ne.s32.totalorder %s837_s0, %s603_s30  ;;  %s25_s27 = int_to_ptr.vmem [resolvable:$true] %s24_s27 }
   0x8   :  { %p607_p1 = scmp.lt.u32.totalorder %s603_s30, %s837_s0 }
   0xa   :  { %p609_p2 = pnand %p607_p1, %p604_p0 }
   0xc   :  { %612 = shalt.err (!%p609_p2)
}
   0xd   :  { %s613_s3 = scalar_lea.vmem %s25_s27, 256  ;;  %p618_p4 = scmp.lt.s32.totalorder %s25_s27, %s25_s27 }
   0xe   :  { %p614_p3 = scmp.ne.s32.totalorder %s25_s27, %s613_s3  ;;  %p619_p5 = scmp.lt.s32.totalorder %s613_s3, %s613_s3 }
  0x10   :  { %p620_p6 = por %p619_p5, %p618_p4 }
  0x12   :  { %p621_p7 = pnand %p620_p6, %p614_p3 }
  0x14   :  { %624 = shalt.err (!%p621_p7)
}
  0x15   :  { %s700_s12 = smov 128   ;;  %s701_s13 = smov 8  }
  0x16   :  { %30 = dma.hbm_to_vmem [thread:$0]  %s837_s0, 256, %s25_s27, [#allocation4], %s700_s12, %s700_s12, %s701_s13  }
  0x17   :  { %s702_s16 = smov [#allocation6]   ;;  %s625_s20 = scalar_lea.hbm %s841_s4, 512 }
  0x18   :  { %s42_s17 = sshll.u32 %s702_s16, 4  ;;  %p626_p8 = scmp.ne.s32.totalorder %s841_s4, %s625_s20  ;;  %s43_s17 = int_to_ptr.vmem [resolvable:$true] %s42_s17 }
  0x19   :  { %p629_p9 = scmp.lt.u32.totalorder %s625_s20, %s841_s4 }
  0x1b   :  { %p631_p10 = pnand %p629_p9, %p626_p8 }
  0x1d   :  { %634 = shalt.err (!%p631_p10)
}
  0x1e   :  { %s635_s25 = scalar_lea.vmem %s43_s17, 512  ;;  %p640_p12 = scmp.lt.s32.totalorder %s43_s17, %s43_s17 }
  0x1f   :  { %p636_p11 = scmp.ne.s32.totalorder %s43_s17, %s635_s25  ;;  %p641_p13 = scmp.lt.s32.totalorder %s635_s25, %s635_s25 }
  0x21   :  { %p642_p0 = por %p641_p13, %p640_p12 }
  0x23   :  { %p643_p1 = pnand %p642_p0, %p636_p11 }
  0x25   :  { %646 = shalt.err (!%p643_p1)
}
  0x26   :  { %48 = dma.hbm_to_vmem [thread:$0]  %s841_s4, 512, %s43_s17, [#allocation7], %s700_s12, %s700_s12, %s701_s13  }
  0x27   :  { %691 = dma.done.wait [#allocation4], 256  }
  0x28   :  { %692 = vsyncadd [#allocation4], 4294967040 }
  0x29   :  { %693 = dma.done.wait [#allocation7], 512  }
  0x2a   :  { %694 = vsyncadd [#allocation7], 4294966784  ;;  %v703_v1 = vmov 0.0   ;;  %vm704_vm0 = vmmov 0   ;;  %v705_v2 = vmov 0   ;;  %vm70_vm1 = vcmask 261120  }
  0x2b   :  { %544 = vmatprep.subr.mxu0 %v703_v1  ;;  %549 = vmatprep.subr.mxu1 %v703_v1  ;;  %v57_v3 = vld [vmem:[#allocation3] sm:$0xff]  ;;  %v58_v4 = vld [vmem:[#allocation3 + $0x8] sm:$0xff]  ;;  %v59_v5 = vld [vmem:[%s839_s2] sm:$0x1]  ;;  %v66_v13 = vlaneseq  ;;  %vm226_vm4 = vcmask 57344   ;;  %vm337_vm5 = vcmask 64512  }
  0x2c   :  { %546 = vmatprep.mubr.msk.f32.mxu0 %vm704_vm0, %v703_v1  ;;  %551 = vmatprep.mubr.msk.f32.mxu1 %vm704_vm0, %v703_v1  ;;  %v60_v6 = vld [vmem:[#allocation2] sm:$0x1]  ;;  %v251_v7 = vld [vmem:[#allocation6] sm:$0xff]  ;;  %v253_v9 = vld [vmem:[#allocation6 + $0x10] sm:$0xff] }
  0x2d   :  { %594 = vset.pattern.permute.xlu0 %v705_v2  ;;  %545 = vmatpush3.xpose.msk.msra.mxu0 %vm70_vm1, %v57_v3  ;;  %v252_v8 = vld [vmem:[#allocation6 + $0x8] sm:$0xff]  ;;  %v254_v11 = vld [vmem:[#allocation6 + $0x18] sm:$0xff]  ;;  %v67_v14 = vshrl.u32 %v66_v13, 7  ;;  %v221_v18 = vld [vmem:[%s838_s1 + $0x1] sm:$0x1] }
  0x2e   :  { %550 = vmatpush3.xpose.msk.msra.mxu1 %vm70_vm1, %v58_v4  ;;  %63 = vperm.xlu0 %594, %v60_v6   ;;  %v575_v10 = vpack.c.bf16 %v252_v8, %v251_v7  ;;  %v579_v12 = vpack.c.bf16 %v254_v11, %v253_v9  ;;  %v220_v19 = vld [vmem:[%s838_s1] sm:$0x1]  ;;  %vm223_vm2 = vcmp.gt.f32.partialorder %v221_v18, 0.5 }
  0x2f   :  { %565 = vmatprep.subr.mxu1 %v703_v1  ;;  %v68_v15 = vsub.s32 0, %v67_v14  ;;  %vm222_vm3 = vcmp.gt.f32.partialorder %v220_v19, 0.5  ;;  %v525_v41 = vld [vmem:[%s842_s5] ss:$0 sm:$0xff]  ;;  %s706_s5 = smov [#allocation9]  }
  0x30   :  { %547 = vmatmul.mubr.msk.f32.vlgmr.msra.gmra.mrb[0].mxu0 %vm70_vm1, %v59_v5  ;;  %576 = vmatprep.subr.bf16.mxu0 %v575_v10  ;;  %s504_s9 = sshll.u32 %s706_s5, 4  ;;  %s505_s9 = int_to_ptr.vmem [resolvable:$true] %s504_s9 }
  0x31   :  { %552 = vmatmul.mubr.msk.f32.vlgmr.msra.gmra.mrb[0].mxu1 %vm70_vm1, %v59_v5  ;;  %562 = vmatprep.mubr.msk.f32.mxu0 %vm70_vm1, %v57_v3  ;;  %s647_s10 = scalar_lea.vmem %s505_s9, 32  ;;  %p652_p3 = scmp.lt.s32.totalorder %s505_s9, %s505_s9 }
  0x32   :  { %567 = vmatprep.mubr.msk.f32.mxu1 %vm704_vm0, %v703_v1  ;;  %578 = vmatpush3.bf16.msra.mxu0 %v575_v10  ;;  %p648_p2 = scmp.ne.s32.totalorder %s505_s9, %s647_s10  ;;  %p653_p4 = scmp.lt.s32.totalorder %s647_s10, %s647_s10 }
  0x33   :  { %580 = vmatprep.subr.bf16.mxu0 %v579_v12 }
  0x34   :  { %p654_p5 = por %p653_p4, %p652_p3 }
  0x36   :  { %582 = vmatpush3.bf16.msra.mxu0 %v579_v12  ;;  %p655_p6 = pnand %p654_p5, %p648_p2 }
  0x39   :  { %563 = vmatmul.mubr.msk.f32.vlgmr.msra.gmra.mrb[2].mxu0 %vm70_vm1, %v58_v4 }
  0xad   :  { %v64_v16 = vpop.permute.xlu0 %63 }
  0xae   :  { %v69_v17 = vrot.slane %v64_v16, %v68_v15 }
 0x103   :  { %v143_v20 = vpop.f32.mrb[0].mxu0 }
 0x104   :  { %v216_v21 = vpop.f32.mrb[0].mxu1  ;;  %v144_v22 = vadd.f32 %v143_v20, %v69_v17  ;;  %v548_v24 = vpop.f32.mrb[1].mxu0 }
 0x105   :  { %v217_v23 = vadd.f32 %v216_v21, %v69_v17  ;;  %v553_v25 = vpop.f32.mrb[1].mxu1 }
 0x106   :  { %v224_v27 = vsel %vm222_vm3, -inf, %v144_v22 }
 0x107   :  { %v225_v26 = vsel %vm223_vm2, -inf, %v217_v23  ;;  %v227_v29 = vsel %vm226_vm4, %v224_v27, -inf }
 0x108   :  { %v230_v28 = vsel %vm226_vm4, %v225_v26, -inf  ;;  %228 = vmax.xlane.f32.xlu0 %v227_v29 }
 0x109   :  { %231 = vmax.xlane.f32.xlu1 %v230_v28 }
 0x10c   :  { %v564_v40 = vpop.f32.mrb[2].mxu0 }
 0x10d   :  { %v328_v42 = vpop.f32.mrb[3].mxu0  ;;  %v334_v43 = vadd.f32 %v564_v40, %v525_v41 }
 0x10e   :  { %v329_v44 = vadd.f32 %v525_v41, %v328_v42 }
 0x110   :  { %566 = vmatpush3.msra.mxu1 %v329_v44 }
 0x111   :  { %570 = vmatprep.subr.mxu1 %v703_v1 }
 0x195   :  { %v229_v31 = vpop.xlane.xlu0 %228 }
 0x196   :  { %v232_v30 = vpop.xlane.xlu1 %231  ;;  %v233_v33 = vsub.f32 %v224_v27, %v229_v31 }
 0x197   :  { %v234_v32 = vsub.f32 %v225_v26, %v232_v30 }
 0x198   :  { %v235_v34 = vmul.f32 1.442695, %v233_v33 }
 0x199   :  { %v237_v35 = vmul.f32 1.442695, %v234_v32 }
 0x19a   :  { %595 = vpow2.f32 %v235_v34 }
 0x19b   :  { %597 = vpow2.f32 %v237_v35 }
 0x1a4   :  { %v596_v36 = vpop.eup %595 }
 0x1a5   :  { %v239_v37 = vsel %vm226_vm4, %v596_v36, 0.0  ;;  %v598_v38 = vpop.eup %597 }
 0x1a6   :  { %240 = vadd.xlane.f32.xlu1 %v239_v37  ;;  %v242_v39 = vsel %vm226_vm4, %v598_v38, 0.0 }
 0x1aa   :  { %243 = vadd.xlane.f32.xlu1 %v242_v39 }
 0x233   :  { %v241_v45 = vpop.xlane.xlu1 %240 }
 0x234   :  { %599 = vrcp.f32 %v241_v45 }
 0x237   :  { %v244_v46 = vpop.xlane.xlu1 %243 }
 0x238   :  { %601 = vrcp.f32 %v244_v46 }
 0x23e   :  { %v600_v47 = vpop.eup %599 }
 0x23f   :  { %v247_v48 = vmul.f32 %v600_v47, %v596_v36 }
 0x241   :  { %249 = vst.msk [vmem:[#allocation9] sm:$0x1] %vm226_vm4, %v247_v48  ;;  %568 = vmatmul.mubr.msk.f32.vlgmr.msra.gmra.mrb[2].mxu1 %vm337_vm5, %v247_v48 }
 0x242   :  { %v602_v49 = vpop.eup %601  ;;  %571 = vmatpush3.msra.mxu1 %v334_v43  ;;  %572 = vmatprep.mubr.msk.f32.mxu1 %vm704_vm0, %v703_v1 }
 0x243   :  { %v248_v50 = vmul.f32 %v602_v49, %v598_v38 }
 0x245   :  { %250 = vst.msk [vmem:[#allocation9 + $0x1] sm:$0x1] %vm226_vm4, %v248_v50  ;;  %573 = vmatmul.mubr.msk.f32.vlgmr.msra.gmra.mrb[4].mxu1 %vm337_vm5, %v248_v50 }
 0x246   :  { %658 = shalt.err (!%p655_p6)
}
 0x247   :  { %s659_s12 = scalar_lea.hbm %s844_s7, 32 }
 0x248   :  { %p660_p7 = scmp.ne.s32.totalorder %s844_s7, %s659_s12  ;;  %p663_p8 = scmp.lt.u32.totalorder %s659_s12, %s844_s7 }
 0x24a   :  { %p665_p9 = pnand %p663_p8, %p660_p7 }
 0x24c   :  { %668 = shalt.err (!%p665_p9)
}
 0x24d   :  { %s707_s17 = smov 16   ;;  %s708_s18 = smov 1   ;;  %vm484_vm6 = vcmask 253952  }
 0x24e   :  { %510 = dma.vmem_to_hbm [thread:$0]  %s505_s9, 32, %s844_s7, [#allocation10], %s707_s17, %s707_s17, %s708_s18  }
 0x24f   :  { %s709_s21 = smov [#allocation8]  }
 0x250   :  { %s492_s22 = sshll.u32 %s709_s21, 4  ;;  %s493_s22 = int_to_ptr.vmem [resolvable:$true] %s492_s22 }
 0x251   :  { %s669_s23 = scalar_lea.vmem %s493_s22, 32  ;;  %p674_p11 = scmp.lt.s32.totalorder %s493_s22, %s493_s22 }
 0x252   :  { %p670_p10 = scmp.ne.s32.totalorder %s493_s22, %s669_s23  ;;  %p675_p12 = scmp.lt.s32.totalorder %s669_s23, %s669_s23 }
 0x254   :  { %p676_p13 = por %p675_p12, %p674_p11 }
 0x256   :  { %p677_p0 = pnand %p676_p13, %p670_p10 }
 0x314   :  { %v407_v51 = vpop.f32.mrb[2].mxu1 }
 0x315   :  { %485 = vst.msk [vmem:[#allocation8] sm:$0x1] %vm484_vm6, %v407_v51  ;;  %v569_v52 = vpop.f32.mrb[3].mxu1 }
 0x318   :  { %v480_v53 = vpop.f32.mrb[4].mxu1 }
 0x319   :  { %486 = vst.msk [vmem:[#allocation8 + $0x1] sm:$0x1] %vm484_vm6, %v480_v53  ;;  %v574_v54 = vpop.f32.mrb[5].mxu1 }
 0x31a   :  { %680 = shalt.err (!%p677_p0)
}
 0x31b   :  { %s681_s7 = scalar_lea.hbm %s843_s6, 32 }
 0x31c   :  { %p682_p1 = scmp.ne.s32.totalorder %s843_s6, %s681_s7  ;;  %p685_p2 = scmp.lt.u32.totalorder %s681_s7, %s843_s6 }
 0x31e   :  { %p687_p3 = pnand %p685_p2, %p682_p1 }
 0x320   :  { %690 = shalt.err (!%p687_p3)
}
 0x321   :  { %498 = dma.vmem_to_hbm [thread:$0]  %s493_s22, 32, %s843_s6, [#allocation5], %s707_s17, %s707_s17, %s708_s18  }
 0x322   :  { %695 = dma.done.wait [#allocation5], 32  }
 0x323   :  { %696 = vsyncadd [#allocation5], 4294967264 }
 0x324   :  { %697 = dma.done.wait [#allocation10], 32  }
 0x325   :  { %698 = vsyncadd [#allocation10], 4294967264 }
 0x326   :  { %517 = vsyncpa [#allocation4], 1 }
 0x327   :  { %518 = vsyncpa [#allocation7], 1 }
 0x328   :  { %519 = vsyncpa [#allocation5], 1 }
 0x329   :  { %520 = vsyncpa [#allocation10], 1 }

</bundles_post_ra>
